<compile_context>
chip_gen: v6e
topology: v6e:2x2x1
jax: 0.10.0
libtpu: 0.0.40
codegen_flags: <defaults>
</compile_context>

<pallas_src>
import jax
import jax.numpy as jnp
from jax.experimental import pallas as pl
from jax.experimental.pallas import tpu as pltpu


# ---------------------------------------------------------------------------
# Pallas kernel: pure VMEM copy (HBM-bandwidth bound; no compute).
# ---------------------------------------------------------------------------
def _copy_kernel(x_ref, o_ref):
    o_ref[...] = x_ref[...]


# ---------------------------------------------------------------------------
# Helpers.
# ---------------------------------------------------------------------------
_SINGLE_BLOCK_BYTES = 1 * 1024 * 1024   # below this: one block, grid=(1,)
_TILE_TARGET_BYTES = 2 * 1024 * 1024    # per-block target; 4 bufs = 8 MiB VMEM
_LANE_CANDIDATES = (8192, 4096, 2048, 1024, 512, 256, 128)


def _squeeze_axes(shape):
    """Axes dropped by torch's x.squeeze(-1).squeeze(-1) (exact semantics)."""
    ndim = len(shape)
    drop = []
    if ndim >= 1 and shape[-1] == 1:
        drop.append(ndim - 1)
        if ndim >= 2 and shape[-2] == 1:
            drop.append(ndim - 2)
    return tuple(drop)


def _pick_lane_width(total):
    """Largest multiple-of-128 lane width that exactly divides `total`."""
    for cand in _LANE_CANDIDATES:
        if total % cand == 0:
            return cand
    return None


def _pick_row_tile(rows, row_bytes, itemsize):
    """Row tile: sublane-aligned, ~2 MiB/block, >=2 grid steps when >1 MiB."""
    sublane = max(8, 8 * (4 // max(itemsize, 1)))  # f32:8, bf16:16, i8:32
    total_bytes = rows * row_bytes
    if total_bytes <= _SINGLE_BLOCK_BYTES:
        return rows  # full extent: exempt from alignment, tiny VMEM footprint
    tile = max(1, _TILE_TARGET_BYTES // max(row_bytes, 1))
    tile = max(sublane, (tile // sublane) * sublane)
    if tile >= rows:
        # Force at least two grid steps so the pipeline can overlap DMAs.
        half = (rows + 1) // 2
        half = ((half + sublane - 1) // sublane) * sublane
        tile = min(half, rows)
    return min(tile, rows)


def _copy_slab_2d(x2d):
    """Tiled, double-buffered copy of a lane-dense (rows, L) slab."""
    rows, lanes = (int(d) for d in x2d.shape)
    itemsize = jnp.dtype(x2d.dtype).itemsize
    tile = _pick_row_tile(rows, lanes * itemsize, itemsize)
    grid = (pl.cdiv(rows, tile),)
    return pl.pallas_call(
        _copy_kernel,
        grid=grid,
        in_specs=[pl.BlockSpec((tile, lanes), lambda i: (i, 0))],
        out_specs=pl.BlockSpec((tile, lanes), lambda i: (i, 0)),
        out_shape=jax.ShapeDtypeStruct((rows, lanes), x2d.dtype),
        compiler_params=pltpu.CompilerParams(
            dimension_semantics=("parallel",)),
    )(x2d)


def _flatten_only_pallas(x, out_shape):
    """Materialized copy via a lane-dense 2D Pallas slab copy."""
    total = 1
    for d in out_shape:
        total *= int(d)

    if len(out_shape) == 0 or total == 0:
        # Scalar / empty output: nothing meaningful to copy; metadata reshape.
        return x.reshape(out_shape)

    x_flat = x.reshape((total,))  # metadata-only flatten of contiguous buffer
    lanes = _pick_lane_width(total)

    if lanes is not None:
        y = _copy_slab_2d(x_flat.reshape((total // lanes, lanes)))
        return y.reshape(out_shape)

    main = (total // 128) * 128
    if main == 0:
        # Tiny array (< 128 elems): one full-extent block (exempt from the
        # lane-multiple rule); grid overhead is irrelevant at this size.
        y = _copy_slab_2d(x_flat.reshape((1, total)))
        return y.reshape(out_shape)

    # 128-aligned prefix through the lane-dense kernel; <128-elem tail via XLA.
    lanes_m = _pick_lane_width(main)
    head = _copy_slab_2d(
        x_flat[:main].reshape((main // lanes_m, lanes_m))).reshape((main,))
    tail = x_flat[main:]
    return jnp.concatenate([head, tail]).reshape(out_shape)


def flatten_only(x: jax.Array, *, materialize: bool = False) -> jax.Array:
    """Equivalent of torch `x.squeeze(-1).squeeze(-1)`.

    Default: metadata-only (no kernel, no HBM traffic).
    materialize=True: lane-dense tiled Pallas copy producing a fresh buffer.
    """
    in_shape = tuple(int(d) for d in x.shape)
    drop = _squeeze_axes(in_shape)

    if not drop:
        # Nothing to squeeze: identity, never launch a copy kernel.
        return x

    out_shape = tuple(d for i, d in enumerate(in_shape) if i not in set(drop))

    if not materialize:
        # Squeeze is a pure metadata op in XLA — fastest possible path.
        return jnp.squeeze(x, axis=drop)

    return _flatten_only_pallas(x, out_shape)


if __name__ == "__main__":
    key = jax.random.PRNGKey(0)

    # Canonical FlattenOnly input: post-global-pool feature map (N, C, 1, 1).
    N, C = 2, 4
    x = jax.random.normal(key, (N, C, 1, 1), dtype=jnp.float32)
    y_ref = jnp.squeeze(x, axis=(-1, -2))

    # Default (metadata-only) path.
    y_fast = jax.block_until_ready(flatten_only(x))
    assert y_fast.shape == (N, C) and y_fast.dtype == x.dtype
    assert jnp.array_equal(y_fast, y_ref)

    # Materialized Pallas path (tiny full-extent block).
    y_kern = jax.block_until_ready(flatten_only(x, materialize=True))
    assert y_kern.shape == (N, C) and y_kern.dtype == x.dtype
    assert jnp.array_equal(y_kern, y_ref)

    # Lane-aligned case (total divisible by 128 -> lane-dense slab, grid=(1,)).
    x2 = jax.random.normal(jax.random.PRNGKey(1), (32, 128, 1, 1), jnp.float32)
    y2 = jax.block_until_ready(flatten_only(x2, materialize=True))
    assert jnp.array_equal(y2, jnp.squeeze(x2, axis=(-1, -2)))

    # ~2 MiB case: exercises the tiled, pipelined path (grid >= 2, "parallel").
    x3 = jax.random.normal(jax.random.PRNGKey(2), (512, 1024, 1, 1), jnp.float32)
    y3 = jax.block_until_ready(flatten_only(x3, materialize=True))
    assert jnp.array_equal(y3, jnp.squeeze(x3, axis=(-1, -2)))

    # Total not divisible by 128: prefix via kernel + tiny tail via XLA.
    x4 = jax.random.normal(jax.random.PRNGKey(3), (10, 13, 1, 1), jnp.float32)
    y4 = jax.block_until_ready(flatten_only(x4, materialize=True))
    assert jnp.array_equal(y4, jnp.squeeze(x4, axis=(-1, -2)))

    # bf16 dtype sanity through the kernel path.
    x5 = jax.random.normal(jax.random.PRNGKey(4), (16, 128, 1, 1), jnp.bfloat16)
    y5 = jax.block_until_ready(flatten_only(x5, materialize=True))
    assert y5.dtype == jnp.bfloat16
    assert jnp.array_equal(y5, jnp.squeeze(x5, axis=(-1, -2)))

    # No-squeeze input: short-circuit, no kernel, identity.
    x6 = jax.random.normal(jax.random.PRNGKey(5), (2, 4, 3, 3), jnp.float32)
    y6 = flatten_only(x6)
    assert y6.shape == (2, 4, 3, 3) and jnp.array_equal(y6, x6)

    print("KERNEL_OK")
</pallas_src>

<mosaic_0001>
module attributes {stable_mosaic.version = 11 : i64} {
  func.func @_copy_kernel(%arg0: i32, %arg1: memref<1x8xf32, #tpu.memory_space<vmem>>, %arg2: memref<1x8xf32, #tpu.memory_space<vmem>>) attributes {dimension_semantics = [#tpu.dimension_semantics<parallel>], iteration_bounds = array<i64: 1>, scalar_prefetch = 0 : i64, scratch_operands = 0 : i64, tpu.core_type = #tpu.core_type<tc>, window_params = [{transform_indices = @transform_0, window_bounds = array<i64: 1, 8>}, {transform_indices = @transform_1, window_bounds = array<i64: 1, 8>}]} {
    %c0 = arith.constant 0 : index
    %c0_0 = arith.constant 0 : index
    %0 = vector.load %arg1[%c0, %c0_0] : memref<1x8xf32, #tpu.memory_space<vmem>>, vector<1x8xf32>
    %c0_1 = arith.constant 0 : index
    %c0_2 = arith.constant 0 : index
    %1 = vector.load %arg2[%c0_1, %c0_2] : memref<1x8xf32, #tpu.memory_space<vmem>>, vector<1x8xf32>
    tpu.vector_store %arg2[%c0_1, %c0_2], %0 {strides = array<i32>} : memref<1x8xf32, #tpu.memory_space<vmem>>, vector<1x8xf32>,
    return
  }
  func.func @transform_0(%arg0: i32) -> (i32, i32) {
    %c0_i32 = arith.constant 0 : i32
    %c0_i32_0 = arith.constant 0 : i32
    return %arg0, %c0_i32 : i32, i32
  }
  func.func @transform_1(%arg0: i32) -> (i32, i32) {
    %c0_i32 = arith.constant 0 : i32
    %c0_i32_0 = arith.constant 0 : i32
    return %arg0, %c0_i32 : i32, i32
  }
}

</mosaic_0001>

<bundles_post_ra>
// kernel: tpu_custom_call.1
= control target key start
LH: loop header
LB: loop body
LE: loop exit
PB: predicated region body
PF: predicated region fallthrough
CT: control target
= control target key end

     0   :  { %6 = vsyncpa [#allocation3], 0  ;;  %s103_s0 = inlined_call_operand.hbm [shape: f32[1,8], index: 0, kind: input, shape index: {}]   ;;  %s104_s1 = inlined_call_operand.hbm [shape: f32[1,8], index: 1, kind: output, shape index: {}]  }
   0x1   :  { %7 = vsyncpa [#allocation4], 0  ;;  %s85_s6 = smov [#allocation2]  }
   0x2   :  { %s14_s7 = sshll.u32 %s85_s6, 4  ;;  %s15_s7 = int_to_ptr.vmem [resolvable:$true] %s14_s7 }
   0x3   :  { %s49_s8 = scalar_lea.vmem %s15_s7, 16  ;;  %s53_s9 = scalar_lea.vmem %s15_s7, 32 }
   0x4   :  { %p50_p0 = scmp.ne.s32.totalorder %s15_s7, %s49_s8  ;;  %p54_p1 = scmp.lt.s32.totalorder %s15_s7, %s15_s7 }
   0x5   :  { %p55_p2 = scmp.lt.s32.totalorder %s53_s9, %s49_s8 }
   0x7   :  { %p56_p3 = por %p55_p2, %p54_p1 }
   0x9   :  { %p57_p4 = pnand %p56_p3, %p50_p0 }
   0xb   :  { %60 = shalt.err (!%p57_p4)
}
   0xc   :  { %17 = dma.hbm_to_vmem [thread:$0]  %s103_s0, 16, %s15_s7, [#allocation3]  }
   0xd   :  { %81 = dma.done.wait [#allocation3], 16  }
   0xe   :  { %82 = vsyncadd [#allocation3], 4294967280  ;;  %s86_s12 = smov [#allocation5]   ;;  %vm22_vm0 = vcmask 57344   ;;  %v21_v0 = vld [vmem:[#allocation2] sm:$0x1] }
   0xf   :  { %s30_s13 = sshll.u32 %s86_s12, 4  ;;  %23 = vst.msk [vmem:[#allocation5] sm:$0x1] %vm22_vm0, %v21_v0  ;;  %s31_s13 = int_to_ptr.vmem [resolvable:$true] %s30_s13 }
  0x10   :  { %s61_s14 = scalar_lea.vmem %s31_s13, 16  ;;  %s65_s15 = scalar_lea.vmem %s31_s13, 32 }
  0x11   :  { %p62_p5 = scmp.ne.s32.totalorder %s31_s13, %s61_s14  ;;  %p66_p6 = scmp.lt.s32.totalorder %s31_s13, %s31_s13 }
  0x12   :  { %p67_p7 = scmp.lt.s32.totalorder %s65_s15, %s61_s14 }
  0x14   :  { %p68_p8 = por %p67_p7, %p66_p6 }
  0x16   :  { %p69_p9 = pnand %p68_p8, %p62_p5 }
  0x18   :  { %72 = shalt.err (!%p69_p9)
}
  0x19   :  { %33 = dma.vmem_to_hbm [thread:$0]  %s31_s13, 16, %s104_s1, [#allocation4]  }
  0x1a   :  { %83 = dma.done.wait [#allocation4], 16  }
  0x1b   :  { %84 = vsyncadd [#allocation4], 4294967280 }
  0x1c   :  { %37 = vsyncpa [#allocation3], 1 }
  0x1d   :  { %38 = vsyncpa [#allocation4], 1 }

</bundles_post_ra>
